<compile_context>
chip_gen: v6e
topology: v6e:2x2x1
jax: 0.10.0
libtpu: 0.0.40
codegen_flags: <defaults>
</compile_context>

<pallas_src>
import numpy as np
import jax
import jax.numpy as jnp
from jax.experimental import pallas as pl
from jax.experimental.pallas import tpu as pltpu

VOCAB = 50
EMBED = 32
HIDDEN = 32
NUM_CLASSES = 2
LANE_PAD = 128  # fc output padded to a full lane width


def lstm_model_kernel(bagw_ref, wfold_ref, whh_ref, b_ref, wfc_ref, bfc_ref,
                      out_ref, hseq_ref):
    T = bagw_ref.shape[0]
    H = whh_ref.shape[0]

    # EmbeddingBag(mean) + input projection fused into one matmul (emb folded into wfold):
    # (T, VOCAB) @ (VOCAB, 4H) + (1, 4H)  ->  (T, 4H)
    xp = jnp.dot(bagw_ref[...], wfold_ref[...],
                 preferred_element_type=jnp.float32) + b_ref[...]

    whh = whh_ref[...]                      # (H, 4H), loaded once, reused every step
    h = jnp.zeros((1, H), jnp.float32)
    c = jnp.zeros((1, H), jnp.float32)

    # LSTM recurrence, fully unrolled (T is static); h/c carried in vregs,
    # per-step hidden state written to VMEM scratch row t.
    for t in range(T):
        gates = xp[t:t + 1, :] + jnp.dot(h, whh, preferred_element_type=jnp.float32)
        sg = jax.nn.sigmoid(gates)          # one EUP pass covering i, f, o gates
        tg = jnp.tanh(gates)                # one EUP pass covering g gate
        i_g = sg[:, 0 * H:1 * H]            # PyTorch gate order: i, f, g, o
        f_g = sg[:, 1 * H:2 * H]
        g_g = tg[:, 2 * H:3 * H]
        o_g = sg[:, 3 * H:4 * H]
        c = f_g * c + i_g * g_g
        h = o_g * jnp.tanh(c)
        hseq_ref[pl.ds(t, 1), :] = h

    # fc on the whole hidden sequence, single full-lane (T, 128) store.
    out_ref[...] = (jnp.dot(hseq_ref[...], wfc_ref[...],
                            preferred_element_type=jnp.float32) + bfc_ref[...])


def prepare_weights(params):
    """Parameter-only prep (cacheable across calls)."""
    emb = np.asarray(params["embedding"], np.float32)            # (V, E)
    w_ih = np.asarray(params["w_ih"], np.float32)                # (4H, E)
    wfold = emb @ w_ih.T                                         # (V, 4H)
    whh_t = np.asarray(params["w_hh"], np.float32).T             # (H, 4H)
    bias = (np.asarray(params["b_ih"], np.float32)
            + np.asarray(params["b_hh"], np.float32)).reshape(1, -1)   # (1, 4H)
    w_fc = np.asarray(params["w_fc"], np.float32)                # (C, H)
    b_fc = np.asarray(params["b_fc"], np.float32)                # (C,)
    C, H = w_fc.shape
    wfc_pad = np.zeros((H, LANE_PAD), np.float32)
    wfc_pad[:, :C] = w_fc.T
    bfc_pad = np.zeros((1, LANE_PAD), np.float32)
    bfc_pad[0, :C] = b_fc
    return {
        "wfold": jnp.asarray(wfold),
        "whh_t": jnp.asarray(whh_t),
        "bias": jnp.asarray(bias),
        "wfc_pad": jnp.asarray(wfc_pad),
        "bfc_pad": jnp.asarray(bfc_pad),
        "num_classes": C,
    }


def build_bag_weights(text_sequence, offsets, vocab_size):
    """Vectorized (single scatter) (T, VOCAB) mean-bag weight matrix."""
    text = np.asarray(text_sequence, np.int64)
    offs = np.asarray(offsets, np.int64)
    n_tok = text.shape[0]
    T = offs.shape[0]
    ends = np.concatenate([offs[1:], np.array([n_tok], np.int64)])
    lengths = ends - offs
    rows = np.repeat(np.arange(T, dtype=np.int64), lengths)
    inv = np.zeros(T, np.float32)
    nz = lengths > 0
    inv[nz] = 1.0 / lengths[nz].astype(np.float32)
    w = np.repeat(inv, lengths)
    bagw = np.zeros((T, vocab_size), np.float32)
    np.add.at(bagw, (rows, text), w)        # duplicates accumulate, empty bags stay zero
    return jnp.asarray(bagw)


def lstm_model_forward(text_sequence, offsets, prep):
    bagw = build_bag_weights(text_sequence, offsets, VOCAB)
    T = bagw.shape[0]

    vmem_spec = pl.BlockSpec(memory_space=pltpu.MemorySpace.VMEM)
    fn = pl.pallas_call(
        lstm_model_kernel,
        out_shape=jax.ShapeDtypeStruct((T, LANE_PAD), jnp.float32),
        in_specs=[vmem_spec] * 6,
        out_specs=vmem_spec,
        scratch_shapes=[pltpu.VMEM((T, HIDDEN), jnp.float32)],
    )
    out_padded = fn(bagw, prep["wfold"], prep["whh_t"], prep["bias"],
                    prep["wfc_pad"], prep["bfc_pad"])
    return out_padded[:, :prep["num_classes"]]


def reference_forward(text_sequence, offsets, params):
    """Pure numpy reference of the PyTorch forward pass."""
    text = np.asarray(text_sequence)
    offs = np.asarray(offsets)
    n_tok = text.shape[0]
    T = offs.shape[0]
    ends = np.concatenate([offs[1:], [n_tok]])
    emb = np.asarray(params["embedding"])
    x = np.stack([emb[text[offs[b]:ends[b]]].mean(axis=0) for b in range(T)])

    w_ih = np.asarray(params["w_ih"])
    w_hh = np.asarray(params["w_hh"])
    b = np.asarray(params["b_ih"]) + np.asarray(params["b_hh"])
    H = w_hh.shape[1]
    h = np.zeros(H, np.float32)
    c = np.zeros(H, np.float32)

    def sig(z):
        return 1.0 / (1.0 + np.exp(-z))

    hs = []
    for t in range(T):
        g = x[t] @ w_ih.T + h @ w_hh.T + b
        i_g, f_g = sig(g[0:H]), sig(g[H:2 * H])
        g_g, o_g = np.tanh(g[2 * H:3 * H]), sig(g[3 * H:4 * H])
        c = f_g * c + i_g * g_g
        h = o_g * np.tanh(c)
        hs.append(h)
    h_seq = np.stack(hs)
    return h_seq @ np.asarray(params["w_fc"]).T + np.asarray(params["b_fc"])


if __name__ == "__main__":
    key = jax.random.PRNGKey(0)
    ks = jax.random.split(key, 8)
    scale = 0.1
    params = {
        "embedding": scale * jax.random.normal(ks[0], (VOCAB, EMBED), jnp.float32),
        "w_ih": scale * jax.random.normal(ks[1], (4 * HIDDEN, EMBED), jnp.float32),
        "w_hh": scale * jax.random.normal(ks[2], (4 * HIDDEN, HIDDEN), jnp.float32),
        "b_ih": scale * jax.random.normal(ks[3], (4 * HIDDEN,), jnp.float32),
        "b_hh": scale * jax.random.normal(ks[4], (4 * HIDDEN,), jnp.float32),
        "w_fc": scale * jax.random.normal(ks[5], (NUM_CLASSES, HIDDEN), jnp.float32),
        "b_fc": scale * jax.random.normal(ks[6], (NUM_CLASSES,), jnp.float32),
    }

    # 8 "sentences" (bags) flattened torch EmbeddingBag style: flat token ids + bag offsets.
    text_sequence = np.array(jax.random.randint(ks[7], (26,), 0, VOCAB), dtype=np.int32)
    offsets = np.array([0, 3, 6, 10, 13, 16, 19, 22], dtype=np.int32)

    prep = prepare_weights(params)          # cacheable, parameter-only
    out = lstm_model_forward(text_sequence, offsets, prep)
    out = jax.block_until_ready(out)

    ref = reference_forward(text_sequence, offsets, params)
    np.testing.assert_allclose(np.asarray(out), ref, rtol=2e-3, atol=2e-3)
    print("KERNEL_OK")
</pallas_src>

<mosaic_0001>
module attributes {stable_mosaic.version = 11 : i64} {
  func.func @lstm_model_kernel(%arg0: memref<8x50xf32, #tpu.memory_space<vmem>>, %arg1: memref<50x128xf32, #tpu.memory_space<vmem>>, %arg2: memref<32x128xf32, #tpu.memory_space<vmem>>, %arg3: memref<1x128xf32, #tpu.memory_space<vmem>>, %arg4: memref<32x128xf32, #tpu.memory_space<vmem>>, %arg5: memref<1x128xf32, #tpu.memory_space<vmem>>, %arg6: memref<8x128xf32, #tpu.memory_space<vmem>>, %arg7: memref<8x32xf32, #tpu.memory_space<vmem>>) attributes {dimension_semantics = [], scalar_prefetch = 0 : i64, scratch_operands = 1 : i64, tpu.core_type = #tpu.core_type<tc>} {
    %c0 = arith.constant 0 : index
    %c0_0 = arith.constant 0 : index
    %0 = vector.load %arg0[%c0, %c0_0] : memref<8x50xf32, #tpu.memory_space<vmem>>, vector<8x50xf32>
    %c0_1 = arith.constant 0 : index
    %c0_2 = arith.constant 0 : index
    %1 = vector.load %arg1[%c0_1, %c0_2] : memref<50x128xf32, #tpu.memory_space<vmem>>, vector<50x128xf32>
    %cst = arith.constant dense<0.000000e+00> : vector<8x128xf32>
    %2 = tpu.matmul %0, %1, %cst {dimension_numbers = #tpu.dot_dimension_numbers<[1], [0], [0], [1], [0, 0, 1, 1], [], []>} : vector<8x50xf32>, vector<50x128xf32>, vector<8x128xf32> -> vector<8x128xf32>
    %c0_3 = arith.constant 0 : index
    %c0_4 = arith.constant 0 : index
    %3 = vector.load %arg3[%c0_3, %c0_4] : memref<1x128xf32, #tpu.memory_space<vmem>>, vector<1x128xf32>
    %4 = vector.broadcast %3 : vector<1x128xf32> to vector<8x128xf32>
    %5 = arith.addf %2, %4 : vector<8x128xf32>
    %c0_5 = arith.constant 0 : index
    %c0_6 = arith.constant 0 : index
    %6 = vector.load %arg2[%c0_5, %c0_6] : memref<32x128xf32, #tpu.memory_space<vmem>>, vector<32x128xf32>
    %cst_7 = arith.constant 0.000000e+00 : f32
    %7 = vector.broadcast %cst_7 : f32 to vector<1x32xf32>
    %cst_8 = arith.constant 0.000000e+00 : f32
    %8 = vector.broadcast %cst_8 : f32 to vector<1x32xf32>
    %9 = vector.extract_strided_slice %5 {offsets = [0, 0], sizes = [1, 128], strides = [1, 1]} : vector<8x128xf32> to vector<1x128xf32>
    %cst_9 = arith.constant dense<0.000000e+00> : vector<1x128xf32>
    %10 = tpu.matmul %7, %6, %cst_9 {dimension_numbers = #tpu.dot_dimension_numbers<[1], [0], [0], [1], [0, 0, 1, 1], [], []>} : vector<1x32xf32>, vector<32x128xf32>, vector<1x128xf32> -> vector<1x128xf32>
    %11 = arith.addf %9, %10 : vector<1x128xf32>
    %12 = arith.negf %11 : vector<1x128xf32>
    %13 = math.exp %12 : vector<1x128xf32>
    %cst_10 = arith.constant 1.000000e+00 : f32
    %14 = vector.broadcast %cst_10 : f32 to vector<1x128xf32>
    %15 = arith.addf %14, %13 : vector<1x128xf32>
    %16 = arith.divf %14, %15 : vector<1x128xf32>
    %17 = math.tanh %11 : vector<1x128xf32>
    %18 = vector.extract_strided_slice %16 {offsets = [0, 0], sizes = [1, 32], strides = [1, 1]} : vector<1x128xf32> to vector<1x32xf32>
    %19 = vector.extract_strided_slice %16 {offsets = [0, 32], sizes = [1, 32], strides = [1, 1]} : vector<1x128xf32> to vector<1x32xf32>
    %20 = vector.extract_strided_slice %17 {offsets = [0, 64], sizes = [1, 32], strides = [1, 1]} : vector<1x128xf32> to vector<1x32xf32>
    %21 = vector.extract_strided_slice %16 {offsets = [0, 96], sizes = [1, 32], strides = [1, 1]} : vector<1x128xf32> to vector<1x32xf32>
    %22 = arith.mulf %19, %8 : vector<1x32xf32>
    %23 = arith.mulf %18, %20 : vector<1x32xf32>
    %24 = arith.addf %22, %23 : vector<1x32xf32>
    %25 = math.tanh %24 : vector<1x32xf32>
    %26 = arith.mulf %21, %25 : vector<1x32xf32>
    %c0_11 = arith.constant 0 : index
    %c0_12 = arith.constant 0 : index
    %27 = vector.load %arg7[%c0_11, %c0_12] : memref<8x32xf32, #tpu.memory_space<vmem>>, vector<1x32xf32>
    tpu.vector_store %arg7[%c0_11, %c0_12], %26 {strides = array<i32>} : memref<8x32xf32, #tpu.memory_space<vmem>>, vector<1x32xf32>,
    %28 = vector.extract_strided_slice %5 {offsets = [1, 0], sizes = [1, 128], strides = [1, 1]} : vector<8x128xf32> to vector<1x128xf32>
    %cst_13 = arith.constant dense<0.000000e+00> : vector<1x128xf32>
    %29 = tpu.matmul %26, %6, %cst_13 {dimension_numbers = #tpu.dot_dimension_numbers<[1], [0], [0], [1], [0, 0, 1, 1], [], []>} : vector<1x32xf32>, vector<32x128xf32>, vector<1x128xf32> -> vector<1x128xf32>
    %30 = arith.addf %28, %29 : vector<1x128xf32>
    %31 = arith.negf %30 : vector<1x128xf32>
    %32 = math.exp %31 : vector<1x128xf32>
    %cst_14 = arith.constant 1.000000e+00 : f32
    %33 = vector.broadcast %cst_14 : f32 to vector<1x128xf32>
    %34 = arith.addf %33, %32 : vector<1x128xf32>
    %35 = arith.divf %33, %34 : vector<1x128xf32>
    %36 = math.tanh %30 : vector<1x128xf32>
    %37 = vector.extract_strided_slice %35 {offsets = [0, 0], sizes = [1, 32], strides = [1, 1]} : vector<1x128xf32> to vector<1x32xf32>
    %38 = vector.extract_strided_slice %35 {offsets = [0, 32], sizes = [1, 32], strides = [1, 1]} : vector<1x128xf32> to vector<1x32xf32>
    %39 = vector.extract_strided_slice %36 {offsets = [0, 64], sizes = [1, 32], strides = [1, 1]} : vector<1x128xf32> to vector<1x32xf32>
    %40 = vector.extract_strided_slice %35 {offsets = [0, 96], sizes = [1, 32], strides = [1, 1]} : vector<1x128xf32> to vector<1x32xf32>
    %41 = arith.mulf %38, %24 : vector<1x32xf32>
    %42 = arith.mulf %37, %39 : vector<1x32xf32>
    %43 = arith.addf %41, %42 : vector<1x32xf32>
    %44 = math.tanh %43 : vector<1x32xf32>
    %45 = arith.mulf %40, %44 : vector<1x32xf32>
    %c1 = arith.constant 1 : index
    %c0_15 = arith.constant 0 : index
    %46 = vector.load %arg7[%c1, %c0_15] : memref<8x32xf32, #tpu.memory_space<vmem>>, vector<1x32xf32>
    tpu.vector_store %arg7[%c1, %c0_15], %45 {strides = array<i32>} : memref<8x32xf32, #tpu.memory_space<vmem>>, vector<1x32xf32>,
    %47 = vector.extract_strided_slice %5 {offsets = [2, 0], sizes = [1, 128], strides = [1, 1]} : vector<8x128xf32> to vector<1x128xf32>
    %cst_16 = arith.constant dense<0.000000e+00> : vector<1x128xf32>
    %48 = tpu.matmul %45, %6, %cst_16 {dimension_numbers = #tpu.dot_dimension_numbers<[1], [0], [0], [1], [0, 0, 1, 1], [], []>} : vector<1x32xf32>, vector<32x128xf32>, vector<1x128xf32> -> vector<1x128xf32>
    %49 = arith.addf %47, %48 : vector<1x128xf32>
    %50 = arith.negf %49 : vector<1x128xf32>
    %51 = math.exp %50 : vector<1x128xf32>
    %cst_17 = arith.constant 1.000000e+00 : f32
    %52 = vector.broadcast %cst_17 : f32 to vector<1x128xf32>
    %53 = arith.addf %52, %51 : vector<1x128xf32>
    %54 = arith.divf %52, %53 : vector<1x128xf32>
    %55 = math.tanh %49 : vector<1x128xf32>
    %56 = vector.extract_strided_slice %54 {offsets = [0, 0], sizes = [1, 32], strides = [1, 1]} : vector<1x128xf32> to vector<1x32xf32>
    %57 = vector.extract_strided_slice %54 {offsets = [0, 32], sizes = [1, 32], strides = [1, 1]} : vector<1x128xf32> to vector<1x32xf32>
    %58 = vector.extract_strided_slice %55 {offsets = [0, 64], sizes = [1, 32], strides = [1, 1]} : vector<1x128xf32> to vector<1x32xf32>
    %59 = vector.extract_strided_slice %54 {offsets = [0, 96], sizes = [1, 32], strides = [1, 1]} : vector<1x128xf32> to vector<1x32xf32>
    %60 = arith.mulf %57, %43 : vector<1x32xf32>
    %61 = arith.mulf %56, %58 : vector<1x32xf32>
    %62 = arith.addf %60, %61 : vector<1x32xf32>
    %63 = math.tanh %62 : vector<1x32xf32>
    %64 = arith.mulf %59, %63 : vector<1x32xf32>
    %c2 = arith.constant 2 : index
    %c0_18 = arith.constant 0 : index
    %65 = vector.load %arg7[%c2, %c0_18] : memref<8x32xf32, #tpu.memory_space<vmem>>, vector<1x32xf32>
    tpu.vector_store %arg7[%c2, %c0_18], %64 {strides = array<i32>} : memref<8x32xf32, #tpu.memory_space<vmem>>, vector<1x32xf32>,
    %66 = vector.extract_strided_slice %5 {offsets = [3, 0], sizes = [1, 128], strides = [1, 1]} : vector<8x128xf32> to vector<1x128xf32>
    %cst_19 = arith.constant dense<0.000000e+00> : vector<1x128xf32>
    %67 = tpu.matmul %64, %6, %cst_19 {dimension_numbers = #tpu.dot_dimension_numbers<[1], [0], [0], [1], [0, 0, 1, 1], [], []>} : vector<1x32xf32>, vector<32x128xf32>, vector<1x128xf32> -> vector<1x128xf32>
    %68 = arith.addf %66, %67 : vector<1x128xf32>
    %69 = arith.negf %68 : vector<1x128xf32>
    %70 = math.exp %69 : vector<1x128xf32>
    %cst_20 = arith.constant 1.000000e+00 : f32
    %71 = vector.broadcast %cst_20 : f32 to vector<1x128xf32>
    %72 = arith.addf %71, %70 : vector<1x128xf32>
    %73 = arith.divf %71, %72 : vector<1x128xf32>
    %74 = math.tanh %68 : vector<1x128xf32>
    %75 = vector.extract_strided_slice %73 {offsets = [0, 0], sizes = [1, 32], strides = [1, 1]} : vector<1x128xf32> to vector<1x32xf32>
    %76 = vector.extract_strided_slice %73 {offsets = [0, 32], sizes = [1, 32], strides = [1, 1]} : vector<1x128xf32> to vector<1x32xf32>
    %77 = vector.extract_strided_slice %74 {offsets = [0, 64], sizes = [1, 32], strides = [1, 1]} : vector<1x128xf32> to vector<1x32xf32>
    %78 = vector.extract_strided_slice %73 {offsets = [0, 96], sizes = [1, 32], strides = [1, 1]} : vector<1x128xf32> to vector<1x32xf32>
    %79 = arith.mulf %76, %62 : vector<1x32xf32>
    %80 = arith.mulf %75, %77 : vector<1x32xf32>
    %81 = arith.addf %79, %80 : vector<1x32xf32>
    %82 = math.tanh %81 : vector<1x32xf32>
    %83 = arith.mulf %78, %82 : vector<1x32xf32>
    %c3 = arith.constant 3 : index
    %c0_21 = arith.constant 0 : index
    %84 = vector.load %arg7[%c3, %c0_21] : memref<8x32xf32, #tpu.memory_space<vmem>>, vector<1x32xf32>
    tpu.vector_store %arg7[%c3, %c0_21], %83 {strides = array<i32>} : memref<8x32xf32, #tpu.memory_space<vmem>>, vector<1x32xf32>,
    %85 = vector.extract_strided_slice %5 {offsets = [4, 0], sizes = [1, 128], strides = [1, 1]} : vector<8x128xf32> to vector<1x128xf32>
    %cst_22 = arith.constant dense<0.000000e+00> : vector<1x128xf32>
    %86 = tpu.matmul %83, %6, %cst_22 {dimension_numbers = #tpu.dot_dimension_numbers<[1], [0], [0], [1], [0, 0, 1, 1], [], []>} : vector<1x32xf32>, vector<32x128xf32>, vector<1x128xf32> -> vector<1x128xf32>
    %87 = arith.addf %85, %86 : vector<1x128xf32>
    %88 = arith.negf %87 : vector<1x128xf32>
    %89 = math.exp %88 : vector<1x128xf32>
    %cst_23 = arith.constant 1.000000e+00 : f32
    %90 = vector.broadcast %cst_23 : f32 to vector<1x128xf32>
    %91 = arith.addf %90, %89 : vector<1x128xf32>
    %92 = arith.divf %90, %91 : vector<1x128xf32>
    %93 = math.tanh %87 : vector<1x128xf32>
    %94 = vector.extract_strided_slice %92 {offsets = [0, 0], sizes = [1, 32], strides = [1, 1]} : vector<1x128xf32> to vector<1x32xf32>
    %95 = vector.extract_strided_slice %92 {offsets = [0, 32], sizes = [1, 32], strides = [1, 1]} : vector<1x128xf32> to vector<1x32xf32>
    %96 = vector.extract_strided_slice %93 {offsets = [0, 64], sizes = [1, 32], strides = [1, 1]} : vector<1x128xf32> to vector<1x32xf32>
    %97 = vector.extract_strided_slice %92 {offsets = [0, 96], sizes = [1, 32], strides = [1, 1]} : vector<1x128xf32> to vector<1x32xf32>
    %98 = arith.mulf %95, %81 : vector<1x32xf32>
    %99 = arith.mulf %94, %96 : vector<1x32xf32>
    %100 = arith.addf %98, %99 : vector<1x32xf32>
    %101 = math.tanh %100 : vector<1x32xf32>
    %102 = arith.mulf %97, %101 : vector<1x32xf32>
    %c4 = arith.constant 4 : index
    %c0_24 = arith.constant 0 : index
    %103 = vector.load %arg7[%c4, %c0_24] : memref<8x32xf32, #tpu.memory_space<vmem>>, vector<1x32xf32>
    tpu.vector_store %arg7[%c4, %c0_24], %102 {strides = array<i32>} : memref<8x32xf32, #tpu.memory_space<vmem>>, vector<1x32xf32>,
    %104 = vector.extract_strided_slice %5 {offsets = [5, 0], sizes = [1, 128], strides = [1, 1]} : vector<8x128xf32> to vector<1x128xf32>
    %cst_25 = arith.constant dense<0.000000e+00> : vector<1x128xf32>
    %105 = tpu.matmul %102, %6, %cst_25 {dimension_numbers = #tpu.dot_dimension_numbers<[1], [0], [0], [1], [0, 0, 1, 1], [], []>} : vector<1x32xf32>, vector<32x128xf32>, vector<1x128xf32> -> vector<1x128xf32>
    %106 = arith.addf %104, %105 : vector<1x128xf32>
    %107 = arith.negf %106 : vector<1x128xf32>
    %108 = math.exp %107 : vector<1x128xf32>
    %cst_26 = arith.constant 1.000000e+00 : f32
    %109 = vector.broadcast %cst_26 : f32 to vector<1x128xf32>
    %110 = arith.addf %109, %108 : vector<1x128xf32>
    %111 = arith.divf %109, %110 : vector<1x128xf32>
    %112 = math.tanh %106 : vector<1x128xf32>
    %113 = vector.extract_strided_slice %111 {offsets = [0, 0], sizes = [1, 32], strides = [1, 1]} : vector<1x128xf32> to vector<1x32xf32>
    %114 = vector.extract_strided_slice %111 {offsets = [0, 32], sizes = [1, 32], strides = [1, 1]} : vector<1x128xf32> to vector<1x32xf32>
    %115 = vector.extract_strided_slice %112 {offsets = [0, 64], sizes = [1, 32], strides = [1, 1]} : vector<1x128xf32> to vector<1x32xf32>
    %116 = vector.extract_strided_slice %111 {offsets = [0, 96], sizes = [1, 32], strides = [1, 1]} : vector<1x128xf32> to vector<1x32xf32>
    %117 = arith.mulf %114, %100 : vector<1x32xf32>
    %118 = arith.mulf %113, %115 : vector<1x32xf32>
    %119 = arith.addf %117, %118 : vector<1x32xf32>
    %120 = math.tanh %119 : vector<1x32xf32>
    %121 = arith.mulf %116, %120 : vector<1x32xf32>
    %c5 = arith.constant 5 : index
    %c0_27 = arith.constant 0 : index
    %122 = vector.load %arg7[%c5, %c0_27] : memref<8x32xf32, #tpu.memory_space<vmem>>, vector<1x32xf32>
    tpu.vector_store %arg7[%c5, %c0_27], %121 {strides = array<i32>} : memref<8x32xf32, #tpu.memory_space<vmem>>, vector<1x32xf32>,
    %123 = vector.extract_strided_slice %5 {offsets = [6, 0], sizes = [1, 128], strides = [1, 1]} : vector<8x128xf32> to vector<1x128xf32>
    %cst_28 = arith.constant dense<0.000000e+00> : vector<1x128xf32>
    %124 = tpu.matmul %121, %6, %cst_28 {dimension_numbers = #tpu.dot_dimension_numbers<[1], [0], [0], [1], [0, 0, 1, 1], [], []>} : vector<1x32xf32>, vector<32x128xf32>, vector<1x128xf32> -> vector<1x128xf32>
    %125 = arith.addf %123, %124 : vector<1x128xf32>
    %126 = arith.negf %125 : vector<1x128xf32>
    %127 = math.exp %126 : vector<1x128xf32>
    %cst_29 = arith.constant 1.000000e+00 : f32
    %128 = vector.broadcast %cst_29 : f32 to vector<1x128xf32>
    %129 = arith.addf %128, %127 : vector<1x128xf32>
    %130 = arith.divf %128, %129 : vector<1x128xf32>
    %131 = math.tanh %125 : vector<1x128xf32>
    %132 = vector.extract_strided_slice %130 {offsets = [0, 0], sizes = [1, 32], strides = [1, 1]} : vector<1x128xf32> to vector<1x32xf32>
    %133 = vector.extract_strided_slice %130 {offsets = [0, 32], sizes = [1, 32], strides = [1, 1]} : vector<1x128xf32> to vector<1x32xf32>
    %134 = vector.extract_strided_slice %131 {offsets = [0, 64], sizes = [1, 32], strides = [1, 1]} : vector<1x128xf32> to vector<1x32xf32>
    %135 = vector.extract_strided_slice %130 {offsets = [0, 96], sizes = [1, 32], strides = [1, 1]} : vector<1x128xf32> to vector<1x32xf32>
    %136 = arith.mulf %133, %119 : vector<1x32xf32>
    %137 = arith.mulf %132, %134 : vector<1x32xf32>
    %138 = arith.addf %136, %137 : vector<1x32xf32>
    %139 = math.tanh %138 : vector<1x32xf32>
    %140 = arith.mulf %135, %139 : vector<1x32xf32>
    %c6 = arith.constant 6 : index
    %c0_30 = arith.constant 0 : index
    %141 = vector.load %arg7[%c6, %c0_30] : memref<8x32xf32, #tpu.memory_space<vmem>>, vector<1x32xf32>
    tpu.vector_store %arg7[%c6, %c0_30], %140 {strides = array<i32>} : memref<8x32xf32, #tpu.memory_space<vmem>>, vector<1x32xf32>,
    %142 = vector.extract_strided_slice %5 {offsets = [7, 0], sizes = [1, 128], strides = [1, 1]} : vector<8x128xf32> to vector<1x128xf32>
    %cst_31 = arith.constant dense<0.000000e+00> : vector<1x128xf32>
    %143 = tpu.matmul %140, %6, %cst_31 {dimension_numbers = #tpu.dot_dimension_numbers<[1], [0], [0], [1], [0, 0, 1, 1], [], []>} : vector<1x32xf32>, vector<32x128xf32>, vector<1x128xf32> -> vector<1x128xf32>
    %144 = arith.addf %142, %143 : vector<1x128xf32>
    %145 = arith.negf %144 : vector<1x128xf32>
    %146 = math.exp %145 : vector<1x128xf32>
    %cst_32 = arith.constant 1.000000e+00 : f32
    %147 = vector.broadcast %cst_32 : f32 to vector<1x128xf32>
    %148 = arith.addf %147, %146 : vector<1x128xf32>
    %149 = arith.divf %147, %148 : vector<1x128xf32>
    %150 = math.tanh %144 : vector<1x128xf32>
    %151 = vector.extract_strided_slice %149 {offsets = [0, 0], sizes = [1, 32], strides = [1, 1]} : vector<1x128xf32> to vector<1x32xf32>
    %152 = vector.extract_strided_slice %149 {offsets = [0, 32], sizes = [1, 32], strides = [1, 1]} : vector<1x128xf32> to vector<1x32xf32>
    %153 = vector.extract_strided_slice %150 {offsets = [0, 64], sizes = [1, 32], strides = [1, 1]} : vector<1x128xf32> to vector<1x32xf32>
    %154 = vector.extract_strided_slice %149 {offsets = [0, 96], sizes = [1, 32], strides = [1, 1]} : vector<1x128xf32> to vector<1x32xf32>
    %155 = arith.mulf %152, %138 : vector<1x32xf32>
    %156 = arith.mulf %151, %153 : vector<1x32xf32>
    %157 = arith.addf %155, %156 : vector<1x32xf32>
    %158 = math.tanh %157 : vector<1x32xf32>
    %159 = arith.mulf %154, %158 : vector<1x32xf32>
    %c7 = arith.constant 7 : index
    %c0_33 = arith.constant 0 : index
    %160 = vector.load %arg7[%c7, %c0_33] : memref<8x32xf32, #tpu.memory_space<vmem>>, vector<1x32xf32>
    tpu.vector_store %arg7[%c7, %c0_33], %159 {strides = array<i32>} : memref<8x32xf32, #tpu.memory_space<vmem>>, vector<1x32xf32>,
    %c0_34 = arith.constant 0 : index
    %c0_35 = arith.constant 0 : index
    %161 = vector.load %arg7[%c0_34, %c0_35] : memref<8x32xf32, #tpu.memory_space<vmem>>, vector<8x32xf32>
    %c0_36 = arith.constant 0 : index
    %c0_37 = arith.constant 0 : index
    %162 = vector.load %arg4[%c0_36, %c0_37] : memref<32x128xf32, #tpu.memory_space<vmem>>, vector<32x128xf32>
    %cst_38 = arith.constant dense<0.000000e+00> : vector<8x128xf32>
    %163 = tpu.matmul %161, %162, %cst_38 {dimension_numbers = #tpu.dot_dimension_numbers<[1], [0], [0], [1], [0, 0, 1, 1], [], []>} : vector<8x32xf32>, vector<32x128xf32>, vector<8x128xf32> -> vector<8x128xf32>
    %c0_39 = arith.constant 0 : index
    %c0_40 = arith.constant 0 : index
    %164 = vector.load %arg5[%c0_39, %c0_40] : memref<1x128xf32, #tpu.memory_space<vmem>>, vector<1x128xf32>
    %165 = vector.broadcast %164 : vector<1x128xf32> to vector<8x128xf32>
    %166 = arith.addf %163, %165 : vector<8x128xf32>
    %c0_41 = arith.constant 0 : index
    %c0_42 = arith.constant 0 : index
    %167 = vector.load %arg6[%c0_41, %c0_42] : memref<8x128xf32, #tpu.memory_space<vmem>>, vector<8x128xf32>
    tpu.vector_store %arg6[%c0_41, %c0_42], %166 {strides = array<i32>} : memref<8x128xf32, #tpu.memory_space<vmem>>, vector<8x128xf32>,
    return
  }
}

</mosaic_0001>

<bundles_post_ra>
// kernel: tpu_custom_call.1
= control target key start
LH: loop header
LB: loop body
LE: loop exit
PB: predicated region body
PF: predicated region fallthrough
CT: control target
= control target key end

     0   :  { %11 = vsyncpa [#allocation4], 0  ;;  %s1787_s0 = inlined_call_operand.hbm [shape: f32[8,50], index: 0, kind: input, shape index: {}]   ;;  %s1788_s1 = inlined_call_operand.hbm [shape: f32[50,128], index: 1, kind: input, shape index: {}]   ;;  %s1789_s2 = inlined_call_operand.hbm [shape: f32[32,128], index: 2, kind: input, shape index: {}]   ;;  %s1790_s3 = inlined_call_operand.vmem [shape: f32[1,128], index: 3, kind: input, shape index: {}]   ;;  %s1791_s4 = inlined_call_operand.hbm [shape: f32[32,128], index: 4, kind: input, shape index: {}]   ;;  %s1792_s5 = inlined_call_operand.vmem [shape: f32[1,128], index: 5, kind: input, shape index: {}]   ;;  %s1793_s6 = inlined_call_operand.hbm [shape: f32[8,128], index: 6, kind: output, shape index: {}]  }
   0x1   :  { %12 = vsyncpa [#allocation7], 0 }
   0x2   :  { %13 = vsyncpa [#allocation10], 0 }
   0x3   :  { %14 = vsyncpa [#allocation5], 0  ;;  %s1535_s21 = smov [#allocation6]  }
   0x4   :  { %s30_s22 = sshll.u32 %s1535_s21, 4  ;;  %s31_s22 = int_to_ptr.vmem [resolvable:$true] %s30_s22 }
   0x5   :  { %s1435_s23 = scalar_lea.vmem %s31_s22, 896  ;;  %p1440_p1 = scmp.lt.s32.totalorder %s31_s22, %s31_s22 }
   0x6   :  { %p1436_p0 = scmp.ne.s32.totalorder %s31_s22, %s1435_s23  ;;  %p1441_p2 = scmp.lt.s32.totalorder %s1435_s23, %s1435_s23 }
   0x8   :  { %p1442_p3 = por %p1441_p2, %p1440_p1 }
   0xa   :  { %p1443_p4 = pnand %p1442_p3, %p1436_p0 }
   0xc   :  { %1446 = shalt.err (!%p1443_p4)
}
   0xd   :  { %s1536_s24 = smov 128   ;;  %s1537_s25 = smov 8  }
   0xe   :  { %36 = dma.hbm_to_vmem [thread:$0]  %s1788_s1, 896, %s31_s22, [#allocation7], %s1536_s24, %s1536_s24, %s1537_s25  }
   0xf   :  { %s1538_s28 = smov [#allocation3]   ;;  %s1539_s30 = smov [#allocation8]  }
  0x10   :  { %s21_s29 = sshll.u32 %s1538_s28, 4  ;;  %s42_s7 = sshll.u32 %s1539_s30, 4  ;;  %s22_s29 = int_to_ptr.vmem [resolvable:$true] %s21_s29  ;;  %s43_s7 = int_to_ptr.vmem [resolvable:$true] %s42_s7 }
  0x11   :  { %s1455_s8 = scalar_lea.vmem %s22_s29, 128  ;;  %p1460_p6 = scmp.lt.s32.totalorder %s22_s29, %s22_s29 }
  0x12   :  { %p1456_p5 = scmp.ne.s32.totalorder %s22_s29, %s1455_s8  ;;  %p1461_p7 = scmp.lt.s32.totalorder %s1455_s8, %s1455_s8 }
  0x14   :  { %p1462_p8 = por %p1461_p7, %p1460_p6 }
  0x16   :  { %p1463_p9 = pnand %p1462_p8, %p1456_p5 }
  0x18   :  { %1466 = shalt.err (!%p1463_p9)
}
  0x19   :  { %24 = dma.hbm_to_vmem [thread:$0]  %s1787_s0, 128, %s22_s29, [#allocation4]  }
  0x1a   :  { %s1475_s11 = scalar_lea.vmem %s43_s7, 512  ;;  %p1480_p11 = scmp.lt.s32.totalorder %s43_s7, %s43_s7 }
  0x1b   :  { %p1476_p10 = scmp.ne.s32.totalorder %s43_s7, %s1475_s11  ;;  %p1481_p12 = scmp.lt.s32.totalorder %s1475_s11, %s1475_s11 }
  0x1d   :  { %p1482_p13 = por %p1481_p12, %p1480_p11 }
  0x1f   :  { %p1483_p0 = pnand %p1482_p13, %p1476_p10 }
  0x21   :  { %1486 = shalt.err (!%p1483_p0)
}
  0x22   :  { %48 = dma.hbm_to_vmem [thread:$0]  %s1789_s2, 512, %s43_s7, [#allocation7], %s1536_s24, %s1536_s24, %s1537_s25  }
  0x23   :  { %s1540_s13 = smov [#allocation9]  }
  0x24   :  { %s56_s14 = sshll.u32 %s1540_s13, 4  ;;  %s57_s14 = int_to_ptr.vmem [resolvable:$true] %s56_s14 }
  0x25   :  { %s1495_s15 = scalar_lea.vmem %s57_s14, 512  ;;  %p1500_p2 = scmp.lt.s32.totalorder %s57_s14, %s57_s14 }
  0x26   :  { %p1496_p1 = scmp.ne.s32.totalorder %s57_s14, %s1495_s15  ;;  %p1501_p3 = scmp.lt.s32.totalorder %s1495_s15, %s1495_s15 }
  0x28   :  { %p1502_p4 = por %p1501_p3, %p1500_p2 }
  0x2a   :  { %p1503_p5 = pnand %p1502_p4, %p1496_p1 }
  0x2c   :  { %1506 = shalt.err (!%p1503_p5)
}
  0x2d   :  { %62 = dma.hbm_to_vmem [thread:$0]  %s1791_s4, 512, %s57_s14, [#allocation10], %s1536_s24, %s1536_s24, %s1537_s25  }
  0x2e   :  { %1527 = dma.done.wait [#allocation4], 128  }
  0x2f   :  { %1528 = vsyncadd [#allocation4], 4294967168 }
  0x30   :  { %1529 = dma.done.wait [#allocation7], 1408  }
  0x31   :  { %1530 = vsyncadd [#allocation7], 4294965888 }
  0x32   :  { %1531 = dma.done.wait [#allocation10], 512  }
  0x33   :  { %1532 = vsyncadd [#allocation10], 4294966784  ;;  %v1541_v0 = vmov 0.0   ;;  %vm1542_vm0 = vmmov 0   ;;  %vm96_vm1 = vcmask 1041408   ;;  %v83_v2 = vld [vmem:[#allocation6 + $0x28] sm:$0xff] }
  0x34   :  { %1236 = vmatprep.subr.mxu0 %v1541_v0  ;;  %1253 = vmatprep.subr.mxu1 %v1541_v0  ;;  %v84_v1 = vld [vmem:[#allocation6 + $0x30] sm:$0x3]  ;;  %v82_v4 = vld [vmem:[#allocation6 + $0x20] sm:$0xff]  ;;  %v1612_v5 = vld [vmem:[#allocation8 + $0x10] sm:$0xff]  ;;  %vm92_vm2 = vcmask 408576   ;;  %s1543_s17 = smov 64  }
  0x35   :  { %1250 = vmatprep.mubr.msk.f32.mxu0 %vm1542_vm0, %v1541_v0  ;;  %1261 = vmatprep.mubr.msk.f32.mxu1 %vm1542_vm0, %v1541_v0  ;;  %v1608_v3 = vld [vmem:[#allocation8 + $0x18] sm:$0xff]  ;;  %v1615_v6 = vld [vmem:[#allocation8 + $0x8] sm:$0xff]  ;;  %v81_v7 = vld [vmem:[#allocation6 + $0x18] sm:$0xff]  ;;  %vm277_vm3 = vcmask 253952   ;;  %vm174_vm4 = vcmask 261120   ;;  %vm386_vm5 = vcmask 254977  }
  0x36   :  { %1237 = vmatpush3.msk.msra.mxu0 %vm96_vm1, %v84_v1  ;;  %1254 = vmatpush3.msra.mxu1 %v1608_v3  ;;  %v1620_v8 = vld [vmem:[#allocation8] sm:$0xff]  ;;  %v80_v9 = vld [vmem:[#allocation6 + $0x10] sm:$0xff]  ;;  %v79_v10 = vld [vmem:[#allocation6 + $0x8] sm:$0xff]  ;;  %vm610_vm6 = vcmask 257027   ;;  %vm834_vm7 = vcmask 259077   ;;  %vm498_vm8 = vcmask 256002  }
  0x37   :  { %1238 = vmatprep.subr.mxu0 %v1541_v0  ;;  %1255 = vmatprep.subr.mxu1 %v1541_v0  ;;  %v78_v11 = vld [vmem:[#allocation6] sm:$0xff]  ;;  %v77_v12 = vld [vmem:[#allocation3] sm:$0xff]  ;;  %v1163_v15 = vld [vmem:[%s1790_s3] ss:$0 sm:$0xff]  ;;  %s1544_s3 = smov 32   ;;  %vm722_vm9 = vcmask 258052  }
  0x38   :  { %1239 = vmatpush3.msra.mxu0 %v83_v2  ;;  %1256 = vmatpush3.msra.mxu1 %v1612_v5  ;;  %vm946_vm10 = vcmask 260102   ;;  %vm1058_vm11 = vcmask 261127   ;;  %s1545_s20 = smov [#allocation11]  }
  0x39   :  { %1240 = vmatprep.subr.mxu0 %v1541_v0  ;;  %1257 = vmatprep.subr.mxu1 %v1541_v0  ;;  %s1152_s21 = sshll.u32 %s1545_s20, 4  ;;  %s1153_s21 = int_to_ptr.vmem [resolvable:$true] %s1152_s21 }
  0x3a   :  { %1241 = vmatpush3.msra.mxu0 %v82_v4  ;;  %1258 = vmatpush3.msra.mxu1 %v1615_v6  ;;  %s1507_s22 = scalar_lea.vmem %s1153_s21, 128  ;;  %p1512_p7 = scmp.lt.s32.totalorder %s1153_s21, %s1153_s21 }
  0x3b   :  { %1242 = vmatprep.subr.mxu0 %v1541_v0  ;;  %1259 = vmatprep.subr.mxu1 %v1541_v0  ;;  %p1508_p6 = scmp.ne.s32.totalorder %s1153_s21, %s1507_s22  ;;  %p1513_p8 = scmp.lt.s32.totalorder %s1507_s22, %s1507_s22 }
  0x3c   :  { %1243 = vmatpush3.msra.mxu0 %v81_v7  ;;  %1260 = vmatpush3.msra.mxu1 %v1620_v8 }
  0x3d   :  { %1244 = vmatprep.subr.mxu0 %v1541_v0  ;;  %1262 = vmatmul.mubr.f32.vlgmr.msra.gmra.mxu1 %v1541_v0  ;;  %p1514_p9 = por %p1513_p8, %p1512_p7 }
  0x3e   :  { %1245 = vmatpush3.msra.mxu0 %v80_v9  ;;  %1264 = vmatprep.subr.mxu1 %v1541_v0 }
  0x3f   :  { %1246 = vmatprep.subr.mxu0 %v1541_v0  ;;  %1265 = vmatpush3.msra.mxu1 %v1608_v3  ;;  %p1515_p10 = pnand %p1514_p9, %p1508_p6 }
  0x40   :  { %1247 = vmatpush3.msra.mxu0 %v79_v10  ;;  %1266 = vmatprep.subr.mxu1 %v1541_v0 }
  0x41   :  { %1248 = vmatprep.subr.mxu0 %v1541_v0  ;;  %1267 = vmatpush3.msra.mxu1 %v1612_v5 }
  0x42   :  { %1249 = vmatpush3.msra.mxu0 %v78_v11  ;;  %1268 = vmatprep.subr.mxu1 %v1541_v0 }
  0x43   :  { %1251 = vmatmul.mubr.msk.f32.vlgmr.msra.gmra.mxu0 %vm92_vm2, %v77_v12  ;;  %1269 = vmatpush3.msra.mxu1 %v1615_v6 }
  0x44   :  { %1272 = vmatprep.mubr.msk.f32.mxu1 %vm1542_vm0, %v1541_v0  ;;  %1270 = vmatprep.subr.mxu1 %v1541_v0 }
  0x45   :  { %1275 = vmatprep.subr.mxu0 %v1541_v0  ;;  %1271 = vmatpush3.msra.mxu1 %v1620_v8 }
  0x46   :  { %1276 = vmatpush3.msra.mxu0 %v1608_v3  ;;  %1283 = vmatprep.mubr.msk.f32.mxu0 %vm1542_vm0, %v1541_v0 }
  0x47   :  { %1277 = vmatprep.subr.mxu0 %v1541_v0  ;;  %1286 = vmatprep.subr.mxu1 %v1541_v0 }
  0x48   :  { %1278 = vmatpush3.msra.mxu0 %v1612_v5 }
  0x49   :  { %1279 = vmatprep.subr.mxu0 %v1541_v0 }
  0x4a   :  { %1280 = vmatpush3.msra.mxu0 %v1615_v6 }
  0x4b   :  { %1281 = vmatprep.subr.mxu0 %v1541_v0 }
  0x4c   :  { %1282 = vmatpush3.msra.mxu0 %v1620_v8 }
  0x4d   :  { %1297 = vmatprep.subr.mxu0 %v1541_v0 }
  0xfd   :  { %v244_v13 = vpop.f32.mrf.mxu1 }
  0xff   :  { %v1263_v14 = vpop.f32.mrf.mxu1 }
 0x103   :  { %v166_v16 = vpop.f32.mrf.mxu0 }
 0x104   :  { %v1655_v17 = vadd.f32 %v1163_v15, %v166_v16 }
 0x105   :  { %v1252_v18 = vpop.f32.mrf.mxu0 }
 0x106   :  { %v248_v19 = vadd.f32 %v244_v13, %v1655_v17 }
 0x108   :  { %1363 = vtanh.f32 %v248_v19  ;;  %v1166_v21 = vmul.f32 -1.442695, %v248_v19 }
 0x10a   :  { %1365 = vpow2.f32 %v1166_v21 }
 0x115   :  { %v1364_v20 = vpop.eup %1363 }
 0x116   :  { %258 = vrot.lane.b32.xlu0 %v1364_v20, %s1543_s17 }
 0x117   :  { %v1366_v22 = vpop.eup %1365 }
 0x118   :  { %v252_v23 = vadd.f32 1.0, %v1366_v22 }
 0x11a   :  { %1367 = vrcp.f32 %v252_v23 }
 0x127   :  { %v1368_v24 = vpop.eup %1367 }
 0x128   :  { %v256_v27 = vmul.f32 0.0, %v1368_v24 }
 0x188   :  { %v259_v25 = vpop.permute.xlu0 %258 }
 0x189   :  { %v261_v26 = vmul.f32 %v1368_v24, %v259_v25 }
 0x18b   :  { %263 = vrot.lane.b32.xlu0 %v261_v26, %s1544_s3 }
 0x1fd   :  { %v264_v28 = vpop.permute.xlu0 %263 }
 0x1fe   :  { %v266_v29 = vadd.f32 %v264_v28, %v256_v27 }
 0x200   :  { %1369 = vtanh.f32 %v266_v29  ;;  %v363_v45 = vrot.slane %v266_v29, 7 }
 0x20d   :  { %v1370_v30 = vpop.eup %1369 }
 0x20e   :  { %269 = vrot.lane.b32.xlu1 %v1370_v30, %s1543_s17 }
 0x280   :  { %v270_v31 = vpop.permute.xlu1 %269 }
 0x281   :  { %v272_v32 = vmul.f32 %v1368_v24, %v270_v31 }
 0x283   :  { %274 = vrot.lane.b32.xlu1 %v272_v32, %s1544_s3 }
 0x2f5   :  { %v275_v33 = vpop.permute.xlu1 %274 }
 0x2f6   :  { %278 = vst.msk [vmem:[#allocation2] sm:$0x1] %vm277_vm3, %v275_v33  ;;  %1273 = vmatmul.mubr.msk.f32.vlgmr.msra.gmra.mxu1 %vm174_vm4, %v275_v33 }
 0x2f7   :  { %1287 = vmatpush3.msra.mxu1 %v1608_v3  ;;  %1294 = vmatprep.mubr.msk.f32.mxu1 %vm1542_vm0, %v1541_v0 }
 0x2f8   :  { %1288 = vmatprep.subr.mxu1 %v1541_v0 }
 0x2f9   :  { %1289 = vmatpush3.msra.mxu1 %v1612_v5 }
 0x2fa   :  { %1290 = vmatprep.subr.mxu1 %v1541_v0 }
 0x2fb   :  { %1291 = vmatpush3.msra.mxu1 %v1615_v6 }
 0x2fc   :  { %1292 = vmatprep.subr.mxu1 %v1541_v0 }
 0x2fd   :  { %1293 = vmatpush3.msra.mxu1 %v1620_v8 }
 0x2fe   :  { %1308 = vmatprep.subr.mxu1 %v1541_v0 }
 0x3b6   :  { %v347_v34 = vpop.f32.mrf.mxu1 }
 0x3b7   :  { %v352_v35 = vrot.slane %v347_v34, 7 }
 0x3b8   :  { %v1274_v36 = vpop.f32.mrf.mxu1 }
 0x3b9   :  { %v354_v37 = vadd.f32 %v352_v35, %v1655_v17 }
 0x3bb   :  { %1371 = vtanh.f32 %v354_v37  ;;  %v1168_v39 = vmul.f32 -1.442695, %v354_v37 }
 0x3bd   :  { %1373 = vpow2.f32 %v1168_v39 }
 0x3c8   :  { %v1372_v38 = vpop.eup %1371 }
 0x3c9   :  { %367 = vrot.lane.b32.xlu0 %v1372_v38, %s1543_s17 }
 0x3ca   :  { %v1374_v40 = vpop.eup %1373 }
 0x3cb   :  { %v358_v41 = vadd.f32 1.0, %v1374_v40 }
 0x3cd   :  { %1375 = vrcp.f32 %v358_v41 }
 0x3da   :  { %v1376_v42 = vpop.eup %1375 }
 0x3db   :  { %v365_v46 = vmul.f32 %v1376_v42, %v363_v45 }
 0x43b   :  { %v368_v43 = vpop.permute.xlu0 %367 }
 0x43c   :  { %v370_v44 = vmul.f32 %v1376_v42, %v368_v43 }
 0x43e   :  { %372 = vrot.lane.b32.xlu1 %v370_v44, %s1544_s3 }
 0x4b0   :  { %v373_v47 = vpop.permute.xlu1 %372 }
 0x4b1   :  { %v375_v48 = vadd.f32 %v373_v47, %v365_v46 }
 0x4b3   :  { %1377 = vtanh.f32 %v375_v48  ;;  %v475_v2 = vrot.slane %v375_v48, 7 }
 0x4c0   :  { %v1378_v49 = vpop.eup %1377 }
 0x4c1   :  { %378 = vrot.lane.b32.xlu0 %v1378_v49, %s1543_s17 }
 0x533   :  { %v379_v50 = vpop.permute.xlu0 %378 }
 0x534   :  { %v1677_v51 = vmul.f32 %v1376_v42, %v379_v50 }
 0x536   :  { %v388_v52 = vrot.slane %v1677_v51, 1 }
 0x538   :  { %389 = vrot.lane.b32.xlu1 %v388_v52, %s1544_s3 }
 0x5aa   :  { %v390_v53 = vpop.permute.xlu1 %389 }
 0x5ab   :  { %1284 = vmatmul.mubr.msk.f32.vlgmr.msra.gmra.mxu0 %vm174_vm4, %v390_v53 }
 0x5ac   :  { %1298 = vmatpush3.msra.mxu0 %v1608_v3  ;;  %1305 = vmatprep.mubr.msk.f32.mxu0 %vm1542_vm0, %v1541_v0 }
 0x5ad   :  { %1299 = vmatprep.subr.mxu0 %v1541_v0 }
 0x5ae   :  { %1300 = vmatpush3.msra.mxu0 %v1612_v5 }
 0x5af   :  { %1301 = vmatprep.subr.mxu0 %v1541_v0 }
 0x5b0   :  { %1302 = vmatpush3.msra.mxu0 %v1615_v6 }
 0x5b1   :  { %1303 = vmatprep.subr.mxu0 %v1541_v0 }
 0x5b2   :  { %1304 = vmatpush3.msra.mxu0 %v1620_v8 }
 0x5b3   :  { %1319 = vmatprep.subr.mxu0 %v1541_v0 }
 0x66b   :  { %v459_v54 = vpop.f32.mrf.mxu0 }
 0x66c   :  { %v464_v55 = vrot.slane %v459_v54, 6 }
 0x66d   :  { %v1285_v56 = vpop.f32.mrf.mxu0 }
 0x66e   :  { %v466_v57 = vadd.f32 %v464_v55, %v1655_v17 }
 0x670   :  { %1379 = vtanh.f32 %v466_v57  ;;  %v1170_v59 = vmul.f32 -1.442695, %v466_v57 }
 0x672   :  { %1381 = vpow2.f32 %v1170_v59 }
 0x67d   :  { %v1380_v58 = vpop.eup %1379 }
 0x67e   :  { %479 = vrot.lane.b32.xlu0 %v1380_v58, %s1543_s17 }
 0x67f   :  { %v1382_v60 = vpop.eup %1381 }
 0x680   :  { %v470_v61 = vadd.f32 1.0, %v1382_v60 }
 0x682   :  { %1383 = vrcp.f32 %v470_v61 }
 0x68f   :  { %v1384_v62 = vpop.eup %1383 }
 0x690   :  { %v477_v4 = vmul.f32 %v1384_v62, %v475_v2 }
 0x6f0   :  { %v480_v63 = vpop.permute.xlu0 %479 }
 0x6f1   :  { %v482_v1 = vmul.f32 %v1384_v62, %v480_v63 }
 0x6f3   :  { %484 = vrot.lane.b32.xlu1 %v482_v1, %s1544_s3 }
 0x765   :  { %v485_v7 = vpop.permute.xlu1 %484 }
 0x766   :  { %v487_v9 = vadd.f32 %v485_v7, %v477_v4 }
 0x768   :  { %1385 = vtanh.f32 %v487_v9  ;;  %v587_v27 = vrot.slane %v487_v9, 7 }
 0x775   :  { %v1386_v10 = vpop.eup %1385 }
 0x776   :  { %490 = vrot.lane.b32.xlu0 %v1386_v10, %s1543_s17 }
 0x7e8   :  { %v491_v11 = vpop.permute.xlu0 %490 }
 0x7e9   :  { %v1696_v12 = vmul.f32 %v1384_v62, %v491_v11 }
 0x7eb   :  { %v500_v13 = vrot.slane %v1696_v12, 2 }
 0x7ed   :  { %501 = vrot.lane.b32.xlu1 %v500_v13, %s1544_s3 }
 0x85f   :  { %v502_v14 = vpop.permute.xlu1 %501 }
 0x860   :  { %1295 = vmatmul.mubr.msk.f32.vlgmr.msra.gmra.mxu1 %vm174_vm4, %v502_v14 }
 0x861   :  { %1309 = vmatpush3.msra.mxu1 %v1608_v3  ;;  %1316 = vmatprep.mubr.msk.f32.mxu1 %vm1542_vm0, %v1541_v0 }
 0x862   :  { %1310 = vmatprep.subr.mxu1 %v1541_v0 }
 0x863   :  { %1311 = vmatpush3.msra.mxu1 %v1612_v5 }
 0x864   :  { %1312 = vmatprep.subr.mxu1 %v1541_v0 }
 0x865   :  { %1313 = vmatpush3.msra.mxu1 %v1615_v6 }
 0x866   :  { %1314 = vmatprep.subr.mxu1 %v1541_v0 }
 0x867   :  { %1315 = vmatpush3.msra.mxu1 %v1620_v8 }
 0x868   :  { %1330 = vmatprep.subr.mxu1 %v1541_v0 }
 0x920   :  { %v571_v15 = vpop.f32.mrf.mxu1 }
 0x921   :  { %v576_v16 = vrot.slane %v571_v15, 5 }
 0x922   :  { %v1296_v18 = vpop.f32.mrf.mxu1 }
 0x923   :  { %v578_v19 = vadd.f32 %v576_v16, %v1655_v17 }
 0x925   :  { %1387 = vtanh.f32 %v578_v19  ;;  %v1172_v21 = vmul.f32 -1.442695, %v578_v19 }
 0x927   :  { %1389 = vpow2.f32 %v1172_v21 }
 0x932   :  { %v1388_v20 = vpop.eup %1387 }
 0x933   :  { %591 = vrot.lane.b32.xlu0 %v1388_v20, %s1543_s17 }
 0x934   :  { %v1390_v22 = vpop.eup %1389 }
 0x935   :  { %v582_v23 = vadd.f32 1.0, %v1390_v22 }
 0x937   :  { %1391 = vrcp.f32 %v582_v23 }
 0x944   :  { %v1392_v24 = vpop.eup %1391 }
 0x945   :  { %v589_v28 = vmul.f32 %v1392_v24, %v587_v27 }
 0x9a5   :  { %v592_v25 = vpop.permute.xlu0 %591 }
 0x9a6   :  { %v594_v26 = vmul.f32 %v1392_v24, %v592_v25 }
 0x9a8   :  { %596 = vrot.lane.b32.xlu1 %v594_v26, %s1544_s3 }
 0xa1a   :  { %v597_v29 = vpop.permute.xlu1 %596 }
 0xa1b   :  { %v599_v30 = vadd.f32 %v597_v29, %v589_v28 }
 0xa1d   :  { %1393 = vtanh.f32 %v599_v30  ;;  %v699_v47 = vrot.slane %v599_v30, 7 }
 0xa2a   :  { %v1394_v31 = vpop.eup %1393 }
 0xa2b   :  { %602 = vrot.lane.b32.xlu0 %v1394_v31, %s1543_s17 }
 0xa9d   :  { %v603_v32 = vpop.permute.xlu0 %602 }
 0xa9e   :  { %v1715_v33 = vmul.f32 %v1392_v24, %v603_v32 }
 0xaa0   :  { %v612_v34 = vrot.slane %v1715_v33, 3 }
 0xaa2   :  { %613 = vrot.lane.b32.xlu1 %v612_v34, %s1544_s3 }
 0xb14   :  { %v614_v35 = vpop.permute.xlu1 %613 }
 0xb15   :  { %1306 = vmatmul.mubr.msk.f32.vlgmr.msra.gmra.mxu0 %vm174_vm4, %v614_v35 }
 0xb16   :  { %1320 = vmatpush3.msra.mxu0 %v1608_v3  ;;  %1327 = vmatprep.mubr.msk.f32.mxu0 %vm1542_vm0, %v1541_v0 }
 0xb17   :  { %1321 = vmatprep.subr.mxu0 %v1541_v0 }
 0xb18   :  { %1322 = vmatpush3.msra.mxu0 %v1612_v5 }
 0xb19   :  { %1323 = vmatprep.subr.mxu0 %v1541_v0 }
 0xb1a   :  { %1324 = vmatpush3.msra.mxu0 %v1615_v6 }
 0xb1b   :  { %1325 = vmatprep.subr.mxu0 %v1541_v0 }
 0xb1c   :  { %1326 = vmatpush3.msra.mxu0 %v1620_v8 }
 0xb1d   :  { %1341 = vmatprep.subr.mxu0 %v1541_v0 }
 0xbd5   :  { %v683_v36 = vpop.f32.mrf.mxu0 }
 0xbd6   :  { %v688_v37 = vrot.slane %v683_v36, 4 }
 0xbd7   :  { %v1307_v38 = vpop.f32.mrf.mxu0 }
 0xbd8   :  { %v690_v39 = vadd.f32 %v688_v37, %v1655_v17 }
 0xbda   :  { %1395 = vtanh.f32 %v690_v39  ;;  %v1174_v41 = vmul.f32 -1.442695, %v690_v39 }
 0xbdc   :  { %1397 = vpow2.f32 %v1174_v41 }
 0xbe7   :  { %v1396_v40 = vpop.eup %1395 }
 0xbe8   :  { %703 = vrot.lane.b32.xlu0 %v1396_v40, %s1543_s17 }
 0xbe9   :  { %v1398_v42 = vpop.eup %1397 }
 0xbea   :  { %v694_v43 = vadd.f32 1.0, %v1398_v42 }
 0xbec   :  { %1399 = vrcp.f32 %v694_v43 }
 0xbf9   :  { %v1400_v44 = vpop.eup %1399 }
 0xbfa   :  { %v701_v48 = vmul.f32 %v1400_v44, %v699_v47 }
 0xc5a   :  { %v704_v45 = vpop.permute.xlu0 %703 }
 0xc5b   :  { %v706_v46 = vmul.f32 %v1400_v44, %v704_v45 }
 0xc5d   :  { %708 = vrot.lane.b32.xlu1 %v706_v46, %s1544_s3 }
 0xccf   :  { %v709_v49 = vpop.permute.xlu1 %708 }
 0xcd0   :  { %v711_v50 = vadd.f32 %v709_v49, %v701_v48 }
 0xcd2   :  { %1401 = vtanh.f32 %v711_v50 }
 0xcdf   :  { %v1402_v52 = vpop.eup %1401 }
 0xce0   :  { %714 = vrot.lane.b32.xlu0 %v1402_v52, %s1543_s17 }
 0xd52   :  { %v715_v53 = vpop.permute.xlu0 %714 }
 0xd53   :  { %v1734_v54 = vmul.f32 %v1400_v44, %v715_v53 }
 0xd55   :  { %v724_v55 = vrot.slane %v1734_v54, 4 }
 0xd57   :  { %725 = vrot.lane.b32.xlu1 %v724_v55, %s1544_s3 }
 0xdc9   :  { %v726_v56 = vpop.permute.xlu1 %725 }
 0xdca   :  { %1317 = vmatmul.mubr.msk.f32.vlgmr.msra.gmra.mxu1 %vm174_vm4, %v726_v56  ;;  %v1063_v56 = vld [vmem:[#allocation9 + $0x10] sm:$0xff] }
 0xdcb   :  { %1331 = vmatpush3.msra.mxu1 %v1608_v3  ;;  %1338 = vmatprep.mubr.msk.f32.mxu1 %vm1542_vm0, %v1541_v0 }
 0xdcc   :  { %1332 = vmatprep.subr.mxu1 %v1541_v0 }
 0xdcd   :  { %1333 = vmatpush3.msra.mxu1 %v1612_v5 }
 0xdce   :  { %1334 = vmatprep.subr.mxu1 %v1541_v0 }
 0xdcf   :  { %1335 = vmatpush3.msra.mxu1 %v1615_v6 }
 0xdd0   :  { %1336 = vmatprep.subr.mxu1 %v1541_v0 }
 0xdd1   :  { %1337 = vmatpush3.msra.mxu1 %v1620_v8  ;;  %v811_v8 = vrot.slane %v711_v50, 7 }
 0xe8a   :  { %v795_v57 = vpop.f32.mrf.mxu1 }
 0xe8b   :  { %v800_v58 = vrot.slane %v795_v57, 3  ;;  %v1062_v57 = vld [vmem:[#allocation9 + $0x8] sm:$0xff] }
 0xe8c   :  { %v1318_v59 = vpop.f32.mrf.mxu1 }
 0xe8d   :  { %v802_v3 = vadd.f32 %v800_v58, %v1655_v17  ;;  %v1061_v58 = vld [vmem:[#allocation9] sm:$0xff] }
 0xe8f   :  { %1403 = vtanh.f32 %v802_v3  ;;  %v1176_v61 = vmul.f32 -1.442695, %v802_v3 }
 0xe91   :  { %1405 = vpow2.f32 %v1176_v61 }
 0xe9c   :  { %v1404_v60 = vpop.eup %1403 }
 0xe9d   :  { %815 = vrot.lane.b32.xlu0 %v1404_v60, %s1543_s17 }
 0xe9e   :  { %v1406_v5 = vpop.eup %1405 }
 0xe9f   :  { %v806_v62 = vadd.f32 1.0, %v1406_v5 }
 0xea1   :  { %1407 = vrcp.f32 %v806_v62 }
 0xeae   :  { %v1408_v63 = vpop.eup %1407 }
 0xeaf   :  { %v813_v2 = vmul.f32 %v1408_v63, %v811_v8 }
 0xf0f   :  { %v816_v6 = vpop.permute.xlu0 %815 }
 0xf10   :  { %v818_v1 = vmul.f32 %v1408_v63, %v816_v6 }
 0xf12   :  { %820 = vrot.lane.b32.xlu1 %v818_v1, %s1544_s3 }
 0xf84   :  { %v821_v4 = vpop.permute.xlu1 %820 }
 0xf85   :  { %v823_v7 = vadd.f32 %v821_v4, %v813_v2 }
 0xf87   :  { %1409 = vtanh.f32 %v823_v7  ;;  %v923_v27 = vrot.slane %v823_v7, 7 }
 0xf94   :  { %v1410_v9 = vpop.eup %1409 }
 0xf95   :  { %826 = vrot.lane.b32.xlu0 %v1410_v9, %s1543_s17 }
0x1007   :  { %v827_v10 = vpop.permute.xlu0 %826 }
0x1008   :  { %v829_v11 = vmul.f32 %v1408_v63, %v827_v10 }
0x100a   :  { %v836_v13 = vrot.slane %v829_v11, 5 }
0x100c   :  { %837 = vrot.lane.b32.xlu1 %v836_v13, %s1544_s3 }
0x107e   :  { %v838_v14 = vpop.permute.xlu1 %837 }
0x107f   :  { %1328 = vmatmul.mubr.msk.f32.vlgmr.msra.gmra.mxu0 %vm174_vm4, %v838_v14 }
0x1080   :  { %1349 = vmatprep.mubr.msk.f32.mxu0 %vm1542_vm0, %v1541_v0 }
0x113f   :  { %v907_v15 = vpop.f32.mrf.mxu0 }
0x1140   :  { %v912_v16 = vrot.slane %v907_v15, 2 }
0x1141   :  { %v1329_v18 = vpop.f32.mrf.mxu0 }
0x1142   :  { %v914_v19 = vadd.f32 %v912_v16, %v1655_v17 }
0x1144   :  { %1411 = vtanh.f32 %v914_v19  ;;  %v1178_v21 = vmul.f32 -1.442695, %v914_v19 }
0x1146   :  { %1413 = vpow2.f32 %v1178_v21 }
0x1151   :  { %v1412_v20 = vpop.eup %1411 }
0x1152   :  { %927 = vrot.lane.b32.xlu0 %v1412_v20, %s1543_s17 }
0x1153   :  { %v1414_v22 = vpop.eup %1413 }
0x1154   :  { %v918_v23 = vadd.f32 1.0, %v1414_v22 }
0x1156   :  { %1415 = vrcp.f32 %v918_v23 }
0x1163   :  { %v1416_v24 = vpop.eup %1415 }
0x1164   :  { %v925_v28 = vmul.f32 %v1416_v24, %v923_v27 }
0x11c4   :  { %v928_v25 = vpop.permute.xlu0 %927 }
0x11c5   :  { %v930_v26 = vmul.f32 %v1416_v24, %v928_v25 }
0x11c7   :  { %932 = vrot.lane.b32.xlu1 %v930_v26, %s1544_s3 }
0x1239   :  { %v933_v29 = vpop.permute.xlu1 %932 }
0x123a   :  { %v935_v30 = vadd.f32 %v933_v29, %v925_v28 }
0x123c   :  { %1417 = vtanh.f32 %v935_v30 }
0x1249   :  { %v1418_v31 = vpop.eup %1417 }
0x124a   :  { %938 = vrot.lane.b32.xlu0 %v1418_v31, %s1543_s17 }
0x12bc   :  { %v939_v32 = vpop.permute.xlu0 %938 }
0x12bd   :  { %v941_v34 = vmul.f32 %v1416_v24, %v939_v32 }
0x12bf   :  { %v948_v35 = vrot.slane %v941_v34, 6 }
0x12c1   :  { %949 = vrot.lane.b32.xlu1 %v948_v35, %s1544_s3 }
0x1333   :  { %v950_v36 = vpop.permute.xlu1 %949 }
0x1334   :  { %1339 = vmatmul.mubr.msk.f32.vlgmr.msra.gmra.mxu1 %vm174_vm4, %v950_v36 }
0x13f4   :  { %v1019_v37 = vpop.f32.mrf.mxu1 }
0x13f5   :  { %v1024_v38 = vrot.slane %v1019_v37, 1 }
0x13f6   :  { %v1340_v39 = vpop.f32.mrf.mxu1 }
0x13f7   :  { %v1026_v40 = vadd.f32 %v1024_v38, %v1655_v17  ;;  %v1035_v17 = vrot.slane %v935_v30, 7 }
0x13f9   :  { %1419 = vtanh.f32 %v1026_v40  ;;  %v1180_v42 = vmul.f32 -1.442695, %v1026_v40 }
0x13fb   :  { %1421 = vpow2.f32 %v1180_v42 }
0x1406   :  { %v1420_v41 = vpop.eup %1419 }
0x1407   :  { %1039 = vrot.lane.b32.xlu0 %v1420_v41, %s1543_s17 }
0x1408   :  { %v1422_v43 = vpop.eup %1421 }
0x1409   :  { %v1030_v44 = vadd.f32 1.0, %v1422_v43 }
0x140b   :  { %1423 = vrcp.f32 %v1030_v44 }
0x1418   :  { %v1424_v45 = vpop.eup %1423 }
0x1419   :  { %v1037_v48 = vmul.f32 %v1424_v45, %v1035_v17 }
0x1479   :  { %v1040_v46 = vpop.permute.xlu0 %1039 }
0x147a   :  { %v1042_v47 = vmul.f32 %v1424_v45, %v1040_v46 }
0x147c   :  { %1044 = vrot.lane.b32.xlu1 %v1042_v47, %s1544_s3 }
0x1480   :  { %383 = vrot.lane.b32.xlu1 %v1677_v51, %s1544_s3 }
0x1484   :  { %607 = vrot.lane.b32.xlu1 %v1715_v33, %s1544_s3  ;;  %v1064_v33 = vld [vmem:[#allocation9 + $0x18] sm:$0xff] }
0x1485   :  { %1342 = vmatpush3.msra.mxu0 %v1064_v33 }
0x1486   :  { %1343 = vmatprep.subr.mxu0 %v1541_v0 }
0x1487   :  { %1344 = vmatpush3.msra.mxu0 %v1063_v56 }
0x1488   :  { %831 = vrot.lane.b32.xlu1 %v829_v11, %s1544_s3  ;;  %1345 = vmatprep.subr.mxu0 %v1541_v0 }
0x1489   :  { %1346 = vmatpush3.msra.mxu0 %v1062_v57 }
0x148a   :  { %1347 = vmatprep.subr.mxu0 %v1541_v0  ;;  %v1181_v0 = vld [vmem:[%s1792_s5] ss:$0 sm:$0xff] }
0x148b   :  { %1348 = vmatpush3.msra.mxu0 %v1061_v58 }
0x14ee   :  { %v1045_v49 = vpop.permute.xlu1 %1044 }
0x14ef   :  { %v1047_v50 = vadd.f32 %v1045_v49, %v1037_v48 }
0x14f1   :  { %1425 = vtanh.f32 %v1047_v50 }
0x14f2   :  { %v384_v52 = vpop.permute.xlu1 %383 }
0x14f3   :  { %387 = vst.msk [vmem:[#allocation2] sm:$0x2] %vm386_vm5, %v384_v52 }
0x14f6   :  { %v608_v53 = vpop.permute.xlu1 %607 }
0x14f7   :  { %611 = vst.msk [vmem:[#allocation2] sm:$0x8] %vm610_vm6, %v608_v53 }
0x14fa   :  { %v832_v55 = vpop.permute.xlu1 %831 }
0x14fb   :  { %835 = vst.msk [vmem:[#allocation2] sm:$0x20] %vm834_vm7, %v832_v55 }
0x14fe   :  { %v1426_v51 = vpop.eup %1425 }
0x14ff   :  { %1050 = vrot.lane.b32.xlu0 %v1426_v51, %s1543_s17 }
0x1503   :  { %495 = vrot.lane.b32.xlu0 %v1696_v12, %s1544_s3 }
0x1507   :  { %719 = vrot.lane.b32.xlu0 %v1734_v54, %s1544_s3 }
0x150b   :  { %943 = vrot.lane.b32.xlu0 %v941_v34, %s1544_s3 }
0x1571   :  { %v1051_v12 = vpop.permute.xlu0 %1050 }
0x1572   :  { %v1053_v59 = vmul.f32 %v1424_v45, %v1051_v12 }
0x1574   :  { %1055 = vrot.lane.b32.xlu1 %v1053_v59, %s1544_s3 }
0x1575   :  { %v496_v54 = vpop.permute.xlu0 %495 }
0x1576   :  { %499 = vst.msk [vmem:[#allocation2] sm:$0x4] %vm498_vm8, %v496_v54 }
0x1579   :  { %v720_v3 = vpop.permute.xlu0 %719 }
0x157a   :  { %723 = vst.msk [vmem:[#allocation2] sm:$0x10] %vm722_vm9, %v720_v3 }
0x157d   :  { %v944_v60 = vpop.permute.xlu0 %943 }
0x157e   :  { %947 = vst.msk [vmem:[#allocation2] sm:$0x40] %vm946_vm10, %v944_v60 }
0x15e6   :  { %v1056_v61 = vpop.permute.xlu1 %1055 }
0x15e7   :  { %1059 = vst.msk [vmem:[#allocation2] sm:$0x80] %vm1058_vm11, %v1056_v61 }
0x15ee   :  { %v1060_v5 = vld [vmem:[#allocation2] sm:$0xff] }
0x15ef   :  { %1350 = vmatmul.mubr.msk.f32.vlgmr.msra.gmra.mxu0 %vm174_vm4, %v1060_v5 }
0x16af   :  { %v1141_v62 = vpop.f32.mrf.mxu0 }
0x16b0   :  { %v1142_v63 = vadd.f32 %v1181_v0, %v1141_v62 }
0x16b1   :  { %v1351_v6 = vpop.f32.mrf.mxu0 }
0x16b2   :  { %1145 = vst [vmem:[#allocation11] sm:$0xff] %v1142_v63 }
0x16b3   :  { %1518 = shalt.err (!%p1515_p10)
}
0x16b4   :  { %1155 = dma.vmem_to_hbm [thread:$0]  %s1153_s21, 128, %s1793_s6, [#allocation5]  }
0x16b5   :  { %1533 = dma.done.wait [#allocation5], 128  }
0x16b6   :  { %1534 = vsyncadd [#allocation5], 4294967168 }
0x16b7   :  { %1159 = vsyncpa [#allocation4], 1 }
0x16b8   :  { %1160 = vsyncpa [#allocation7], 1 }
0x16b9   :  { %1161 = vsyncpa [#allocation10], 1 }
0x16ba   :  { %1162 = vsyncpa [#allocation5], 1 }

</bundles_post_ra>
